<compile_context>
chip_gen: v6e
topology: v6e:2x2x1
jax: 0.10.0
libtpu: 0.0.40
codegen_flags: <defaults>
</compile_context>

<pallas_src>
import math
import numpy as np
import jax
import jax.numpy as jnp
from jax.experimental import pallas as pl
from jax.experimental.pallas import tpu as pltpu


# ---------------------------------------------------------------------------
# Kernel A: fused QKV projection
# ---------------------------------------------------------------------------
def qkv_proj_kernel(x_ref, w_ref, b_ref, out_ref):
    x = x_ref[...]                                  # (ts, D) f32
    w = w_ref[...]                                  # (D, 3D) compute dtype
    y = jnp.dot(x.astype(w.dtype), w, preferred_element_type=jnp.float32) + b_ref[...]
    out_ref[...] = y.astype(out_ref.dtype)


# ---------------------------------------------------------------------------
# Kernel B: per-(batch, head) flash attention (online softmax over KV tiles)
# ---------------------------------------------------------------------------
def flash_attn_kernel(q_ref, k_ref, v_ref, o_ref, m_sc, l_sc, acc_sc):
    ki = pl.program_id(3)

    @pl.when(ki == 0)
    def _():
        m_sc[...] = jnp.full_like(m_sc, -jnp.inf)
        l_sc[...] = jnp.zeros_like(l_sc)
        acc_sc[...] = jnp.zeros_like(acc_sc)

    q = q_ref[...]                                  # (tq, dk); scale folded into Wq
    k = k_ref[...]                                  # (tk, dk)
    # Contract last axes directly (no materialized k.T / XLU transpose).
    s = jax.lax.dot_general(q, k, (((1,), (1,)), ((), ())),
                            preferred_element_type=jnp.float32)  # (tq, tk)

    m_prev = m_sc[...]
    m_new = jnp.maximum(m_prev, jnp.max(s, axis=-1, keepdims=True))
    alpha = jnp.exp(m_prev - m_new)
    p = jnp.exp(s - m_new)
    l_sc[...] = alpha * l_sc[...] + jnp.sum(p, axis=-1, keepdims=True)
    acc_sc[...] = alpha * acc_sc[...] + jnp.dot(
        p.astype(v_ref.dtype), v_ref[...], preferred_element_type=jnp.float32)
    m_sc[...] = m_new

    @pl.when(ki == pl.num_programs(3) - 1)
    def _():
        denom = l_sc[...]
        inv = pl.reciprocal(denom, approx=True)     # EUP slot
        inv = inv * (2.0 - denom * inv)             # Newton steps: cheap VPU ops on a
        inv = inv * (2.0 - denom * inv)             # (tq,1) vector -> f32-accurate
        o_ref[...] = (acc_sc[...] * inv).astype(o_ref.dtype)


# ---------------------------------------------------------------------------
# Kernel C: output projection + residual + LN + MLP + residual + LN
# ---------------------------------------------------------------------------
def out_mlp_kernel(ctx_ref, x_ref, wo_ref, bo_ref, w1_ref, b1_ref,
                   w2_ref, b2_ref, g1_ref, be1_ref, g2_ref, be2_ref, out_ref):
    eps = 1e-5

    def layer_norm(v, g, b):
        mu = jnp.mean(v, axis=-1, keepdims=True)
        var = jnp.mean((v - mu) ** 2, axis=-1, keepdims=True)
        return (v - mu) * jax.lax.rsqrt(var + eps) * g + b

    cd = wo_ref.dtype
    attn_out = jnp.dot(ctx_ref[...].astype(cd), wo_ref[...],
                       preferred_element_type=jnp.float32) + bo_ref[...]
    x1 = layer_norm(x_ref[...] + attn_out, g1_ref[...], be1_ref[...])
    h1 = jnp.maximum(
        jnp.dot(x1.astype(cd), w1_ref[...], preferred_element_type=jnp.float32)
        + b1_ref[...], 0.0)                                        # ReLU act_fn
    mlp_out = jnp.dot(h1.astype(cd), w2_ref[...],
                      preferred_element_type=jnp.float32) + b2_ref[...]
    out_ref[...] = layer_norm(x1 + mlp_out, g2_ref[...], be2_ref[...]).astype(out_ref.dtype)


# ---------------------------------------------------------------------------
# Wrapper
# ---------------------------------------------------------------------------
def block_forward(x, params, num_heads, *, compute_dtype=jnp.float32,
                  seq_tile=64, kv_tile=64):
    B, S, D = x.shape
    assert D % num_heads == 0
    dk = D // num_heads
    Dh = params["w1"].shape[1]

    ts = min(seq_tile, S)
    tk = min(kv_tile, S)
    assert S % ts == 0 and S % tk == 0

    cd = np.dtype(compute_dtype)
    itemsize = cd.itemsize

    # Host-side fusion: single (D, 3D) QKV weight; fold 1/sqrt(dk) into Wq / bq.
    scale = 1.0 / math.sqrt(dk)
    wqkv = jnp.concatenate(
        [params["wq"] * scale, params["wk"], params["wv"]], axis=1).astype(cd)
    bqkv = jnp.concatenate(
        [params["bq"] * scale, params["bk"], params["bv"]], axis=1).astype(jnp.float32)

    # ---- Kernel A: fused QKV projection; grid (B, S/ts), all parallel --------
    qkv = pl.pallas_call(
        qkv_proj_kernel,
        out_shape=jax.ShapeDtypeStruct((B, S, 3 * D), cd),
        grid_spec=pltpu.PrefetchScalarGridSpec(
            num_scalar_prefetch=0,
            grid=(B, S // ts),
            in_specs=[
                pl.BlockSpec((pl.Squeezed(), ts, D), lambda b, i: (b, i, 0)),
                pl.BlockSpec((D, 3 * D), lambda b, i: (0, 0)),
                pl.BlockSpec((1, 3 * D), lambda b, i: (0, 0)),
            ],
            out_specs=pl.BlockSpec((pl.Squeezed(), ts, 3 * D), lambda b, i: (b, i, 0)),
        ),
        compiler_params=pltpu.CompilerParams(
            dimension_semantics=("parallel", "parallel")),
        cost_estimate=pl.CostEstimate(
            flops=int(2 * B * S * D * 3 * D),
            transcendentals=0,
            bytes_accessed=int(x.size * 4 + wqkv.size * itemsize
                               + bqkv.size * 4 + B * S * 3 * D * itemsize)),
    )(x, wqkv, bqkv)

    # Head split (XLA layout plumbing): (B, S, 3D) -> three (B, H, S, dk)
    q = qkv[..., :D].reshape(B, S, num_heads, dk).transpose(0, 2, 1, 3)
    k = qkv[..., D:2 * D].reshape(B, S, num_heads, dk).transpose(0, 2, 1, 3)
    v = qkv[..., 2 * D:].reshape(B, S, num_heads, dk).transpose(0, 2, 1, 3)

    # ---- Kernel B: flash attention; grid (B, H, S/ts, S/tk), KV axis last ----
    ctx = pl.pallas_call(
        flash_attn_kernel,
        out_shape=jax.ShapeDtypeStruct((B, num_heads, S, dk), cd),
        grid_spec=pltpu.PrefetchScalarGridSpec(
            num_scalar_prefetch=0,
            grid=(B, num_heads, S // ts, S // tk),
            in_specs=[
                pl.BlockSpec((pl.Squeezed(), pl.Squeezed(), ts, dk),
                             lambda b, h, qi, ki: (b, h, qi, 0)),
                pl.BlockSpec((pl.Squeezed(), pl.Squeezed(), tk, dk),
                             lambda b, h, qi, ki: (b, h, ki, 0)),
                pl.BlockSpec((pl.Squeezed(), pl.Squeezed(), tk, dk),
                             lambda b, h, qi, ki: (b, h, ki, 0)),
            ],
            out_specs=pl.BlockSpec((pl.Squeezed(), pl.Squeezed(), ts, dk),
                                   lambda b, h, qi, ki: (b, h, qi, 0)),
            scratch_shapes=[pltpu.VMEM((ts, 1), jnp.float32),   # running max
                            pltpu.VMEM((ts, 1), jnp.float32),   # running denom
                            pltpu.VMEM((ts, dk), jnp.float32)], # f32 accumulator
        ),
        compiler_params=pltpu.CompilerParams(
            dimension_semantics=("parallel", "parallel", "parallel", "arbitrary")),
        cost_estimate=pl.CostEstimate(
            flops=int(4 * B * num_heads * S * S * dk),
            transcendentals=int(B * num_heads * S * S),
            bytes_accessed=int(4 * B * num_heads * S * dk * itemsize)),
    )(q, k, v)

    # Head merge (XLA): (B, H, S, dk) -> (B, S, D)
    attn = ctx.transpose(0, 2, 1, 3).reshape(B, S, D)

    # ---- Kernel C: out proj + residual + LN + MLP + residual + LN ------------
    wo = params["wo"].astype(cd)
    w1 = params["w1"].astype(cd)
    w2 = params["w2"].astype(cd)
    param_arrays = [wo, params["bo"], w1, params["b1"], w2, params["b2"],
                    params["g1"], params["be1"], params["g2"], params["be2"]]

    def full_spec(arr):
        return pl.BlockSpec(arr.shape, lambda b, i: (0, 0))

    out = pl.pallas_call(
        out_mlp_kernel,
        out_shape=jax.ShapeDtypeStruct((B, S, D), jnp.float32),
        grid_spec=pltpu.PrefetchScalarGridSpec(
            num_scalar_prefetch=0,
            grid=(B, S // ts),
            in_specs=[
                pl.BlockSpec((pl.Squeezed(), ts, D), lambda b, i: (b, i, 0)),  # attn ctx
                pl.BlockSpec((pl.Squeezed(), ts, D), lambda b, i: (b, i, 0)),  # residual x
            ] + [full_spec(a) for a in param_arrays],
            out_specs=pl.BlockSpec((pl.Squeezed(), ts, D), lambda b, i: (b, i, 0)),
        ),
        compiler_params=pltpu.CompilerParams(
            dimension_semantics=("parallel", "parallel")),
        cost_estimate=pl.CostEstimate(
            flops=int(2 * B * S * (D * D + 2 * D * Dh)),
            transcendentals=int(2 * B * S),
            bytes_accessed=int(B * S * D * (4 + itemsize + 4)
                               + (D * D + 2 * D * Dh) * itemsize)),
    )(attn, x, *param_arrays)
    return out
    # TODO(synk): for production d_hidden / very long S, additionally stream the MLP
    # hidden dim (K-tiling of w1/w2 with a VMEM accumulator) to fit v7x's 64 MiB VMEM.


# ---------------------------------------------------------------------------
# Params / reference
# ---------------------------------------------------------------------------
def init_params(key, d_model, d_hidden):
    ks = jax.random.split(key, 6)
    s_attn = 1.0 / math.sqrt(d_model)
    s_mlp = 1.0 / math.sqrt(d_hidden)
    return {
        "wq": jax.random.normal(ks[0], (d_model, d_model), jnp.float32) * s_attn,
        "bq": jnp.zeros((1, d_model), jnp.float32),
        "wk": jax.random.normal(ks[1], (d_model, d_model), jnp.float32) * s_attn,
        "bk": jnp.zeros((1, d_model), jnp.float32),
        "wv": jax.random.normal(ks[2], (d_model, d_model), jnp.float32) * s_attn,
        "bv": jnp.zeros((1, d_model), jnp.float32),
        "wo": jax.random.normal(ks[3], (d_model, d_model), jnp.float32) * s_attn,
        "bo": jnp.zeros((1, d_model), jnp.float32),
        "w1": jax.random.normal(ks[4], (d_model, d_hidden), jnp.float32) * s_attn,
        "b1": jnp.zeros((1, d_hidden), jnp.float32),
        "w2": jax.random.normal(ks[5], (d_hidden, d_model), jnp.float32) * s_mlp,
        "b2": jnp.zeros((1, d_model), jnp.float32),
        "g1": jnp.ones((1, d_model), jnp.float32),
        "be1": jnp.zeros((1, d_model), jnp.float32),
        "g2": jnp.ones((1, d_model), jnp.float32),
        "be2": jnp.zeros((1, d_model), jnp.float32),
    }


def reference_forward(x, p, num_heads):
    B, S, D = x.shape
    d_k = D // num_heads

    def ln(v, g, b):
        mu = jnp.mean(v, axis=-1, keepdims=True)
        var = jnp.mean((v - mu) ** 2, axis=-1, keepdims=True)
        return (v - mu) / jnp.sqrt(var + 1e-5) * g + b

    q = x @ p["wq"] + p["bq"]
    k = x @ p["wk"] + p["bk"]
    v = x @ p["wv"] + p["bv"]
    q = q.reshape(B, S, num_heads, d_k).transpose(0, 2, 1, 3)
    k = k.reshape(B, S, num_heads, d_k).transpose(0, 2, 1, 3)
    v = v.reshape(B, S, num_heads, d_k).transpose(0, 2, 1, 3)
    scores = jnp.einsum("bhqd,bhkd->bhqk", q, k) / math.sqrt(d_k)
    probs = jax.nn.softmax(scores, axis=-1)
    a = jnp.einsum("bhqk,bhkd->bhqd", probs, v)
    a = a.transpose(0, 2, 1, 3).reshape(B, S, D)
    attn_out = a @ p["wo"] + p["bo"]
    x1 = ln(x + attn_out, p["g1"], p["be1"])
    h1 = jnp.maximum(x1 @ p["w1"] + p["b1"], 0.0)
    mlp_out = h1 @ p["w2"] + p["b2"]
    return ln(x1 + mlp_out, p["g2"], p["be2"])


if __name__ == "__main__":
    # Small but lane-dense shapes (D, 3D, d_hidden all multiples of 128).
    B, S, D, H, D_HIDDEN = 2, 128, 128, 4, 256
    key = jax.random.PRNGKey(0)
    kx, kp = jax.random.split(key)
    x = jax.random.normal(kx, (B, S, D), jnp.float32)
    params = init_params(kp, D, D_HIDDEN)

    ref = reference_forward(x, params, H)

    # f32 matmul inputs (v5e-friendly path): tight check against reference.
    out_f32 = jax.block_until_ready(block_forward(x, params, H, compute_dtype=jnp.float32))
    assert out_f32.shape == (B, S, D)
    assert jnp.allclose(out_f32, ref, atol=2e-4, rtol=2e-4), "f32 kernel mismatch vs reference"

    # bf16 matmul-input fast path (v6e/v7x): f32 accumulation, loose check.
    out_bf16 = jax.block_until_ready(block_forward(x, params, H, compute_dtype=jnp.bfloat16))
    assert bool(jnp.all(jnp.isfinite(out_bf16)))
    assert float(jnp.max(jnp.abs(out_bf16 - ref))) < 0.25, "bf16 kernel diverged from reference"

    print("KERNEL_OK")
</pallas_src>

<mosaic_0001>
module attributes {stable_mosaic.version = 11 : i64} {
  func.func @qkv_proj_kernel(%arg0: i32, %arg1: i32, %arg2: memref<1x64x128xf32, #tpu.memory_space<vmem>>, %arg3: memref<128x384xf32, #tpu.memory_space<vmem>>, %arg4: memref<1x384xf32, #tpu.memory_space<vmem>>, %arg5: memref<1x64x384xf32, #tpu.memory_space<vmem>>) attributes {dimension_semantics = [#tpu.dimension_semantics<parallel>, #tpu.dimension_semantics<parallel>], iteration_bounds = array<i64: 2, 2>, scalar_prefetch = 0 : i64, scratch_operands = 0 : i64, tpu.core_type = #tpu.core_type<tc>, window_params = [{transform_indices = @transform_0, window_bounds = array<i64: 1, 64, 128>}, {pipeline_mode = #tpu.pipeline_mode<synchronous>, transform_indices = @transform_1, window_bounds = array<i64: 128, 384>}, {pipeline_mode = #tpu.pipeline_mode<synchronous>, transform_indices = @transform_2, window_bounds = array<i64: 1, 384>}, {transform_indices = @transform_3, window_bounds = array<i64: 1, 64, 384>}]} {
    %c0 = arith.constant 0 : index
    %c0_0 = arith.constant 0 : index
    %c0_1 = arith.constant 0 : index
    %0 = vector.load %arg2[%c0, %c0_0, %c0_1] : memref<1x64x128xf32, #tpu.memory_space<vmem>>, vector<1x64x128xf32>
    %1 = vector.shape_cast %0 : vector<1x64x128xf32> to vector<64x128xf32>
    %c0_2 = arith.constant 0 : index
    %c0_3 = arith.constant 0 : index
    %2 = vector.load %arg3[%c0_2, %c0_3] : memref<128x384xf32, #tpu.memory_space<vmem>>, vector<128x384xf32>
    %cst = arith.constant dense<0.000000e+00> : vector<64x384xf32>
    %3 = tpu.matmul %1, %2, %cst {dimension_numbers = #tpu.dot_dimension_numbers<[1], [0], [0], [1], [0, 0, 1, 1], [], []>} : vector<64x128xf32>, vector<128x384xf32>, vector<64x384xf32> -> vector<64x384xf32>
    %c0_4 = arith.constant 0 : index
    %c0_5 = arith.constant 0 : index
    %4 = vector.load %arg4[%c0_4, %c0_5] : memref<1x384xf32, #tpu.memory_space<vmem>>, vector<1x384xf32>
    %5 = vector.broadcast %4 : vector<1x384xf32> to vector<64x384xf32>
    %6 = arith.addf %3, %5 : vector<64x384xf32>
    %c0_6 = arith.constant 0 : index
    %c0_7 = arith.constant 0 : index
    %c0_8 = arith.constant 0 : index
    %7 = vector.load %arg5[%c0_6, %c0_7, %c0_8] : memref<1x64x384xf32, #tpu.memory_space<vmem>>, vector<1x64x384xf32>
    %8 = vector.shape_cast %7 : vector<1x64x384xf32> to vector<64x384xf32>
    %9 = vector.shape_cast %6 : vector<64x384xf32> to vector<1x64x384xf32>
    tpu.vector_store %arg5[%c0_6, %c0_7, %c0_8], %9 {strides = array<i32>} : memref<1x64x384xf32, #tpu.memory_space<vmem>>, vector<1x64x384xf32>,
    return
  }
  func.func @transform_0(%arg0: i32, %arg1: i32) -> (i32, i32, i32) {
    %c0_i32 = arith.constant 0 : i32
    %c0_i32_0 = arith.constant 0 : i32
    return %arg0, %arg1, %c0_i32 : i32, i32, i32
  }
  func.func @transform_1(%arg0: i32, %arg1: i32) -> (i32, i32) {
    %c0_i32 = arith.constant 0 : i32
    %c0_i32_0 = arith.constant 0 : i32
    %c0_i32_1 = arith.constant 0 : i32
    return %c0_i32, %c0_i32_0 : i32, i32
  }
  func.func @transform_2(%arg0: i32, %arg1: i32) -> (i32, i32) {
    %c0_i32 = arith.constant 0 : i32
    %c0_i32_0 = arith.constant 0 : i32
    %c0_i32_1 = arith.constant 0 : i32
    return %c0_i32, %c0_i32_0 : i32, i32
  }
  func.func @transform_3(%arg0: i32, %arg1: i32) -> (i32, i32, i32) {
    %c0_i32 = arith.constant 0 : i32
    %c0_i32_0 = arith.constant 0 : i32
    return %arg0, %arg1, %c0_i32 : i32, i32, i32
  }
}

</mosaic_0001>

<bundles_post_ra>
// kernel: tpu_custom_call.1
= control target key start
LH: loop header
LB: loop body
LE: loop exit
PB: predicated region body
PF: predicated region fallthrough
CT: control target
= control target key end

     0   :  { %s1292_s0 = inlined_call_operand.hbm [shape: f32[2,128,128], index: 0, kind: input, shape index: {}]   ;;  %s1293_s1 = inlined_call_operand.hbm [shape: f32[128,384], index: 1, kind: input, shape index: {}]   ;;  %s1294_s2 = inlined_call_operand.vmem [shape: f32[1,384], index: 2, kind: input, shape index: {}]   ;;  %s1295_s3 = inlined_call_operand.hbm [shape: f32[2,128,384], index: 3, kind: output, shape index: {}]  }
   0x1   :  { %1301 = sst [smem:[#allocation15_spill]] %s1293_s1 }
   0x2   :  { %8 = vsyncpa [#allocation3], 0 }
   0x3   :  { %10 = vsyncpa [#allocation3 + $0x1], 0 }
   0x4   :  { %11 = vsyncpa [#allocation6], 0 }
   0x5   :  { %12 = vsyncpa [#allocation4], 0 }
   0x6   :  { %14 = vsyncpa [#allocation4 + $0x1], 0  ;;  %s1026_s12 = smov 0   ;;  %s1028_s13 = smov 0  }
   0x7   :  { %s1030_s14 = smov 0   ;;  %s1032_s15 = smov 0  }
   0x8   :  { %s1034_s16 = smov 0   ;;  %s1036_s17 = smov 0  }
   0x9   :  { %s1038_s18 = smov 0   ;;  %s1040_s19 = smov 0  }
   0xa LB: > { %1302 = sst [smem:[#allocation11_spill]] %s966_s12  ;;  %s656_s20 = sadd.s32 4294967295, %s994_s19   ;;  %s994_s19 = sphi %s1040_s19, %s20_s19   ;;  %s990_s18 = sphi %s1038_s18, %s1325_s18   ;;  %s986_s17 = sphi %s1036_s17, %s1320_s17   ;;  %s982_s16 = sphi %s1034_s16, %s1324_s16   ;;  %s978_s15 = sphi %s1032_s15, %s1319_s15   ;;  %s974_s14 = sphi %s1030_s14, %s1323_s14   ;;  %s970_s13 = sphi %s1028_s13, %s1322_s13   ;;  %s966_s12 = sphi %s1026_s12, %s1321_s12  }
   0xb   : > { %1303 = sst [smem:[#allocation12_spill]] %s986_s17  ;;  %s657_s21 = sadd.s32 4294967294, %s994_s19  }
   0xc   : > { %p54_p0 = scmp.ne.s32.totalorder %s970_s13, %s966_s12  ;;  %p1070_p1 = scmp.eq.s32.totalorder %s656_s20, 0 }
   0xd   : > { %p1074_p2 = scmp.eq.s32.totalorder %s656_s20, 3  ;;  %p128_p3 = scmp.eq.s32.totalorder %s657_s21, 3 }
   0xe   : > { %p1080_p4 = por %p1070_p1, %p54_p0  ;;  %p658_p5 = scmp.ge.s32.totalorder %s994_s19, 1 }
   0xf   : > { %p1085_p6 = por %p128_p3, %p54_p0  ;;  %p135_p7 = scmp.lt.s32.totalorder %s994_s19, 5 }
  0x10   : > { %s1306_s24 = scalar_select %p1080_p4, 1, 0 }
  0x11   : > { %s1307_s25 = scalar_select %p1085_p6, 1, 0 }
  0x12   : > { %p1090_p8 = pnand %p658_p5, %p135_p7  ;;  %s996_s27 = smov [#allocation5]  }
  0x13   : > { %1308 = sst [smem:[#allocation13_spill]] %s1307_s25  ;;  %s147_s28 = sshll.u32 %s996_s27, 4  ;;  %s148_s28 = int_to_ptr.vmem [resolvable:$true] %s147_s28 }
  0x14   : > { %p752_p9 = pneg %p1090_p8  ;;  %s851_s29 = scalar_lea.vmem %s148_s28, 6144 }
  0x15   : > { %p852_p12 = scmp.ne.s32.totalorder %s148_s28, %s851_s29  ;;  %p859_p3 = scmp.lt.s32.totalorder %s148_s28, %s148_s28 }
  0x16   : > { %p753_p10 = pnand %p752_p9, %p1070_p1  ;;  %p860_p6 = scmp.lt.s32.totalorder %s851_s29, %s851_s29 }
  0x18   : > { %p842_p11 = pneg %p753_p10  ;;  %p861_p4 = por %p860_p6, %p859_p3 }
  0x1a   : > { %p854_p13 = pnand %p852_p12, %p842_p11 }
  0x1c   : > { %p855_p0 = pneg %p854_p13 }
  0x1e   : > { %p862_p5 = pnand %p861_p4, %p855_p0 }
  0x20   : > { %865 = shalt.err (!%p862_p5)
}
  0x21   : > { %s997_s30 = smov 384   ;;  %s998_s4 = smov 24  }
  0x22   : > { %s1310_s1 = sld [smem:[#allocation15_spill]]  ;;  %s29_s7 = sadd.s32 1, %s986_s17 }
  0x23   : > { %p30_p4 = scmp.ge.s32.totalorder %s29_s7, 2  ;;  %s32_s8 = sadd.s32 1, %s990_s18 }
  0x24   : > { %s41_s9 = sadd.s32 1, %s974_s14  ;;  %p48_p6 = scmp.ne.s32.totalorder %s974_s14, %s970_s13 }
  0x25   : > { %s1327_s7 = smov (%p30_p4, %s29_s7), 0  ;;  %s1329_s8 = smov (!%p30_p4, %s32_s8), %s990_s18 }
  0x26   : > { %1311 = sst [smem:[#allocation14_spill]] %s1327_s7  ;;  %s37_s10 = ssub.s32 %s986_s17, %s1327_s7 }
  0x27   : > { %p49_p7 = scmp.eq.s32.totalorder %s994_s19, 0  ;;  %p34_p9 = scmp.ge.s32.totalorder %s1329_s8, 2 }
  0x28   : > { %755 = dma.hbm_to_vmem [thread:$0]  (!%p753_p10), %s1310_s1, 6144, %s148_s28, [#allocation6], %s997_s30, %s997_s30, %s998_s4  }
  0x29   : > { %p1114_p11 = por %p1074_p2, %p48_p6  ;;  %p1118_p10 = por %p49_p7, %p48_p6 }
  0x2a   : > { %p765_p12 = scmp.lt.s32.totalorder %s994_s19, 4  ;;  %s1331_s8 = smov (%p34_p9, %s1329_s8), 0 }
  0x2b   : > { %s164_s21 = sand.u32 1, %s974_s14   ;;  %s662_s27 = sshll.u32 %s986_s17, 3 }
  0x2c   : > { %s36_s28 = ssub.s32 %s990_s18, %s1331_s8  ;;  %s661_s30 = sshll.u32 %s164_s21, 6 }
  0x2d   : > { %s38_s29 = sor.u32 %s37_s10, %s36_s28  ;;  %s663_s23 = sshll.u32 %s990_s18, 4 }
  0x2e   : > { %p39_p13 = scmp.eq.s32.totalorder %s38_s29, 0  ;;  %s168_s4 = scalar_lea.vmem [#allocation2], %s661_s30 }
  0x2f   : > { %s177_s5 = sshll.u32 %s168_s4, 4  ;;  %s174_s1 = sadd.s32 %s663_s23, %s662_s27  ;;  %s178_s5 = int_to_ptr.vmem [resolvable:$true] %s177_s5 }
  0x30   : > { %s1131_s6 = scalar_select %p39_p13, %s974_s14, %s41_s9  }
  0x31   : > { %s664_s7 = sshll.u32 %s174_s1, 7  ;;  %p1137_p2 = pnand %p765_p12, %p1118_p10 }
  0x32   : > { %s176_s10 = scalar_lea.hbm %s1292_s0, %s664_s7  ;;  %s165_s28 = scalar_lea.sflag [#allocation3], %s164_s21 }
  0x33   : > { %p868_p0 = pneg %p1137_p2  ;;  %s879_s29 = scalar_lea.vmem %s178_s5, 1024 }
  0x34   : > { %p880_p3 = scmp.ne.s32.totalorder %s178_s5, %s879_s29  ;;  %s999_s9 = smov [#allocation2]  }
  0x35   : > { %s884_s1 = sshll.u32 %s999_s9, 4  ;;  %s885_s1 = int_to_ptr.vmem [resolvable:$false] %s884_s1 }
  0x36   : > { %p882_p5 = pnand %p880_p3, %p868_p0  ;;  %s886_s20 = scalar_lea.vmem %s885_s1, 2048 }
  0x37   : > { %p887_p6 = scmp.lt.s32.totalorder %s178_s5, %s885_s1  ;;  %p888_p7 = scmp.lt.s32.totalorder %s886_s20, %s879_s29 }
  0x38   : > { %p883_p4 = pneg %p882_p5 }
  0x39   : > { %p889_p9 = por %p888_p7, %p887_p6 }
  0x3b   : > { %p890_p10 = pnand %p889_p9, %p883_p4 }
  0x3d   : > { %893 = shalt.err (!%p890_p10)
}
  0x3e   : > { %s1000_s27 = smov 128   ;;  %s1001_s12 = smov 8  }
  0x3f   : > { %759 = dma.hbm_to_vmem [thread:$0]  (!%p1137_p2), %s176_s10, 1024, %s178_s5, %s165_s28, %s1000_s27, %s1000_s27, %s1001_s12  }
  0x40   : > { %189 = sbr.rel (%p1090_p8) target bundleno = 344 (0x158), region = 32  ;;  %s1151_s17 = sand.u32 (!%p1090_p8), 1, %s970_s13  }
  0x41   : > { %s666_s7 = sshll.u32 (!%p1090_p8), %s1151_s17, 6  ;;  %s192_s21 = scalar_lea.sflag (!%p1090_p8), [#allocation3], %s1151_s17 }
  0x42   : > { %s1155_s30 = scalar_lea.vmem (!%p1090_p8), [#allocation2], %s666_s7  ;;  %p1315_p12 = scmp.ne.s32.totalorder (!%p1090_p8), %s1306_s24, 0 }
  0x45   : > { %953 = dma.done.wait (%p1315_p12), %s192_s21, 1024  }
  0x46   : > { %955 = vsyncadd (%p1315_p12), %s192_s21, 4294966272 }
  0x47   : > { %957 = dma.done.wait (%p1070_p1), [#allocation6], 6144  }
  0x48   : > { %959 = vsyncadd (%p1070_p1), [#allocation6], 4294961152  ;;  %v1002_v0 = vmov 0.0   ;;  %v278_v1 = vld [vmem:[#allocation5 + $0x170] sm:$0xff]  ;;  %v277_v2 = vld [vmem:[#allocation5 + $0x168] sm:$0xff]  ;;  %v282_v57 = vlaneseq  ;;  %s741_s25 = smul.u32 192, %s1151_s17 }
  0x49   : > { %361 = vmatprep.mubr.f32.mxu0 %v1002_v0  ;;  %v275_v3 = vld [vmem:[#allocation5 + $0x158] sm:$0xff]  ;;  %297 = vmatprep.subr.mxu0 %v278_v1  ;;  %v274_v4 = vld [vmem:[#allocation5 + $0x150] sm:$0xff]  ;;  %v272_v5 = vld [vmem:[#allocation5 + $0x140] sm:$0xff]  ;;  %s742_s23 = smul.u32 24, %s978_s15  ;;  %s540_s9 = scalar_lea.sflag [#allocation4], %s1151_s17 }
  0x4a   : > { %298 = vmatpush1.msra.mxu0 %v277_v2  ;;  %v271_v6 = vld [vmem:[#allocation5 + $0x138] sm:$0xff]  ;;  %v269_v7 = vld [vmem:[#allocation5 + $0x128] sm:$0xff]  ;;  %v268_v8 = vld [vmem:[#allocation5 + $0x120] sm:$0xff]  ;;  %v283_v58 = vshrl.u32 %v282_v57, 7  ;;  %s1190_s26 = scalar_lea.vmem [#allocation7], %s741_s25  ;;  %s743_s4 = smul.u32 48, %s982_s16 }
  0x4b   : > { %299 = vmatprep.subr.mxu0 %v275_v3  ;;  %v279_v9 = vld [vmem:[#allocation5 + $0x178] sm:$0xff]  ;;  %v266_v10 = vld [vmem:[#allocation5 + $0x110] sm:$0xff]  ;;  %v276_v11 = vld [vmem:[#allocation5 + $0x160] sm:$0xff]  ;;  %s556_s16 = sshll.u32 %s1190_s26, 4  ;;  %s1003_s20 = smov [#allocation7]   ;;  %s1236_s16 = int_to_ptr.vmem [resolvable:$true] %s556_s16 }
  0x4c   : > { %300 = vmatpush1.msra.mxu0 %v274_v4  ;;  %697 = vmatprep.subr.mxu1 %v279_v9  ;;  %v265_v12 = vld [vmem:[#allocation5 + $0x108] sm:$0xff]  ;;  %v263_v14 = vld [vmem:[#allocation5 + $0xf8] sm:$0xff]  ;;  %v262_v15 = vld [vmem:[#allocation5 + $0xf0] sm:$0xff]  ;;  %v284_v59 = vsub.s32 0, %v283_v58  ;;  %v288_v61 = vsub.s32 1, %v283_v58  ;;  %v292_v63 = vsub.s32 2, %v283_v58  ;;  %s553_s5 = sadd.s32 %s743_s4, %s742_s23 }
  0x4d   : > { %301 = vmatprep.subr.mxu0 %v272_v5  ;;  %698 = vmatpush3.msra.mxu1 %v279_v9  ;;  %v273_v13 = vld [vmem:[#allocation5 + $0x148] sm:$0xff]  ;;  %v270_v16 = vld [vmem:[#allocation5 + $0x130] sm:$0xff]  ;;  %v260_v17 = vld [vmem:[#allocation5 + $0xe0] sm:$0xff]  ;;  %s670_s15 = sshll.u32 %s553_s5, 7  ;;  %s894_s1 = scalar_lea.vmem %s1236_s16, 3072 }
  0x4e   : > { %302 = vmatpush1.msra.mxu0 %v271_v6  ;;  %699 = vmatprep.subr.mxu1 %v276_v11  ;;  %v259_v18 = vld [vmem:[#allocation5 + $0xd8] sm:$0xff]  ;;  %v257_v20 = vld [vmem:[#allocation5 + $0xc8] sm:$0xff]  ;;  %v256_v21 = vld [vmem:[#allocation5 + $0xc0] sm:$0xff]  ;;  %s1234_s29 = scalar_lea.hbm %s1295_s3, %s670_s15  ;;  %p895_p1 = scmp.ne.s32.totalorder %s1236_s16, %s894_s1 }
  0x4f   : > { %303 = vmatprep.subr.mxu0 %v269_v7  ;;  %700 = vmatpush3.msra.mxu1 %v276_v11  ;;  %v267_v19 = vld [vmem:[#allocation5 + $0x118] sm:$0xff]  ;;  %v264_v22 = vld [vmem:[#allocation5 + $0x100] sm:$0xff]  ;;  %v254_v23 = vld [vmem:[#allocation5 + $0xb0] sm:$0xff]  ;;  %s898_s27 = sshll.u32 %s1003_s20, 4  ;;  %s899_s27 = int_to_ptr.vmem [resolvable:$false] %s898_s27 }
  0x50   : > { %304 = vmatpush1.msra.mxu0 %v268_v8  ;;  %701 = vmatprep.subr.mxu1 %v273_v13  ;;  %v253_v24 = vld [vmem:[#allocation5 + $0xa8] sm:$0xff]  ;;  %v251_v26 = vld [vmem:[#allocation5 + $0x98] sm:$0xff]  ;;  %v250_v27 = vld [vmem:[#allocation5 + $0x90] sm:$0xff]  ;;  %p896_p8 = pnand %p895_p1, %p1114_p11  ;;  %s900_s12 = scalar_lea.vmem %s899_s27, 6144 }
  0x51   : > { %305 = vmatprep.subr.mxu0 %v266_v10  ;;  %702 = vmatpush3.msra.mxu1 %v273_v13  ;;  %v261_v25 = vld [vmem:[#allocation5 + $0xe8] sm:$0xff]  ;;  %v258_v28 = vld [vmem:[#allocation5 + $0xd0] sm:$0xff]  ;;  %v248_v29 = vld [vmem:[#allocation5 + $0x80] sm:$0xff]  ;;  %p901_p2 = scmp.lt.s32.totalorder %s1236_s16, %s899_s27  ;;  %p902_p0 = scmp.lt.s32.totalorder %s900_s12, %s894_s1 }
  0x52   : > { %306 = vmatpush1.msra.mxu0 %v265_v12  ;;  %703 = vmatprep.subr.mxu1 %v270_v16  ;;  %v247_v30 = vld [vmem:[#allocation5 + $0x78] sm:$0xff]  ;;  %v245_v32 = vld [vmem:[#allocation5 + $0x68] sm:$0xff]  ;;  %v244_v33 = vld [vmem:[#allocation5 + $0x60] sm:$0xff]  ;;  %p897_p13 = pneg %p896_p8 }
  0x53   : > { %307 = vmatprep.subr.mxu0 %v263_v14  ;;  %704 = vmatpush3.msra.mxu1 %v270_v16  ;;  %v255_v31 = vld [vmem:[#allocation5 + $0xb8] sm:$0xff]  ;;  %v252_v34 = vld [vmem:[#allocation5 + $0xa0] sm:$0xff]  ;;  %v242_v35 = vld [vmem:[#allocation5 + $0x50] sm:$0xff]  ;;  %p903_p3 = por %p902_p0, %p901_p2 }
  0x54   : > { %308 = vmatpush1.msra.mxu0 %v262_v15  ;;  %705 = vmatprep.subr.mxu1 %v267_v19  ;;  %v241_v36 = vld [vmem:[#allocation5 + $0x48] sm:$0xff]  ;;  %v239_v38 = vld [vmem:[#allocation5 + $0x38] sm:$0xff]  ;;  %v238_v39 = vld [vmem:[#allocation5 + $0x30] sm:$0xff] }
  0x55   : > { %309 = vmatprep.subr.mxu0 %v260_v17  ;;  %706 = vmatpush3.msra.mxu1 %v267_v19  ;;  %v249_v37 = vld [vmem:[#allocation5 + $0x88] sm:$0xff]  ;;  %v246_v40 = vld [vmem:[#allocation5 + $0x70] sm:$0xff]  ;;  %v236_v41 = vld [vmem:[#allocation5 + $0x20] sm:$0xff]  ;;  %p904_p5 = pnand %p903_p3, %p897_p13 }
  0x56   : > { %310 = vmatpush1.msra.mxu0 %v259_v18  ;;  %707 = vmatprep.subr.mxu1 %v264_v22  ;;  %v235_v42 = vld [vmem:[#allocation5 + $0x18] sm:$0xff]  ;;  %v233_v44 = vld [vmem:[#allocation5 + $0x8] sm:$0xff]  ;;  %v232_v45 = vld [vmem:[#allocation5] sm:$0xff] }
  0x57   : > { %311 = vmatprep.subr.mxu0 %v257_v20  ;;  %708 = vmatpush3.msra.mxu1 %v264_v22  ;;  %v243_v43 = vld [vmem:[#allocation5 + $0x58] sm:$0xff]  ;;  %v240_v46 = vld [vmem:[#allocation5 + $0x40] sm:$0xff]  ;;  %v237_v48 = vld [vmem:[#allocation5 + $0x28] sm:$0xff] }
  0x58   : > { %312 = vmatpush1.msra.mxu0 %v256_v21  ;;  %709 = vmatprep.subr.mxu1 %v261_v25  ;;  %v224_v47 = vld [vmem:[%s1155_s30] sm:$0xff]  ;;  %v234_v49 = vld [vmem:[#allocation5 + $0x10] sm:$0xff]  ;;  %v225_v50 = vld [vmem:[%s1155_s30 + $0x8] sm:$0xff] }
  0x59   : > { %313 = vmatprep.subr.mxu0 %v254_v23  ;;  %710 = vmatpush3.msra.mxu1 %v261_v25  ;;  %v226_v51 = vld [vmem:[%s1155_s30 + $0x10] sm:$0xff]  ;;  %v227_v52 = vld [vmem:[%s1155_s30 + $0x18] sm:$0xff]  ;;  %v228_v53 = vld [vmem:[%s1155_s30 + $0x20] sm:$0xff] }
  0x5a   : > { %314 = vmatpush1.msra.mxu0 %v253_v24  ;;  %711 = vmatprep.subr.mxu1 %v258_v28  ;;  %v230_v54 = vld [vmem:[%s1155_s30 + $0x30] sm:$0xff]  ;;  %v229_v55 = vld [vmem:[%s1155_s30 + $0x28] sm:$0xff]  ;;  %v231_v56 = vld [vmem:[%s1155_s30 + $0x38] sm:$0xff] }
  0x5b   : > { %315 = vmatprep.subr.mxu0 %v251_v26  ;;  %712 = vmatpush3.msra.mxu1 %v258_v28  ;;  %v280_v60 = vld [vmem:[%s1294_s2] sm:$0x7] }
  0x5c   : > { %316 = vmatpush1.msra.mxu0 %v250_v27  ;;  %713 = vmatprep.subr.mxu1 %v255_v31  ;;  %v1185_v62 = vrot.slane %v280_v60, %v284_v59  ;;  %v1187_v1 = vrot.slane %v280_v60, %v288_v61 }
  0x5d   : > { %317 = vmatprep.subr.mxu0 %v248_v29  ;;  %714 = vmatpush3.msra.mxu1 %v255_v31 }
  0x5e   : > { %318 = vmatpush1.msra.mxu0 %v247_v30  ;;  %715 = vmatprep.subr.mxu1 %v252_v34 }
  0x5f   : > { %319 = vmatprep.subr.mxu0 %v245_v32  ;;  %716 = vmatpush3.msra.mxu1 %v252_v34 }
  0x60   : > { %320 = vmatpush1.msra.mxu0 %v244_v33  ;;  %717 = vmatprep.subr.mxu1 %v249_v37 }
  0x61   : > { %321 = vmatprep.subr.mxu0 %v242_v35  ;;  %718 = vmatpush3.msra.mxu1 %v249_v37 }
  0x62   : > { %322 = vmatpush1.msra.mxu0 %v241_v36  ;;  %719 = vmatprep.subr.mxu1 %v246_v40 }
  0x63   : > { %323 = vmatprep.subr.mxu0 %v239_v38  ;;  %720 = vmatpush3.msra.mxu1 %v246_v40 }
  0x64   : > { %324 = vmatpush1.msra.mxu0 %v238_v39  ;;  %721 = vmatprep.subr.mxu1 %v243_v43 }
  0x65   : > { %325 = vmatprep.subr.mxu0 %v236_v41  ;;  %722 = vmatpush3.msra.mxu1 %v243_v43 }
  0x66   : > { %326 = vmatpush1.msra.mxu0 %v235_v42  ;;  %723 = vmatprep.subr.mxu1 %v240_v46 }
  0x67   : > { %327 = vmatprep.subr.mxu0 %v233_v44  ;;  %724 = vmatpush3.msra.mxu1 %v240_v46 }
  0x68   : > { %328 = vmatpush1.msra.mxu0 %v232_v45  ;;  %725 = vmatprep.subr.mxu1 %v237_v48 }
  0x69   : > { %362 = vmatmul.mubr.f32.vlgmr.msra.gmra.mxu0 %v224_v47  ;;  %726 = vmatpush3.msra.mxu1 %v237_v48 }
  0x6a   : > { %367 = vmatprep.mubr.f32.mxu0 %v1002_v0  ;;  %729 = vmatprep.mubr.f32.mxu1 %v224_v47 }
  0x6b   : > { %727 = vmatprep.subr.mxu1 %v234_v49 }
  0x6c   : > { %728 = vmatpush3.msra.mxu1 %v234_v49 }
  0x6d   : > { %368 = vmatmul.mubr.f32.gmra.mxu0 %v225_v50  ;;  %730 = vmatmul.mubr.f32.vlgmr.msra.gmra.mxu1 %v225_v50 }
  0x6e   : > { %373 = vmatprep.mubr.f32.mxu0 %v1002_v0  ;;  %732 = vmatprep.mubr.f32.mxu1 %v226_v51 }
  0x71   : > { %374 = vmatmul.mubr.f32.gmra.mxu0 %v226_v51  ;;  %733 = vmatmul.mubr.f32.gmra.mxu1 %v227_v52 }
  0x72   : > { %379 = vmatprep.mubr.f32.mxu0 %v1002_v0  ;;  %735 = vmatprep.mubr.f32.mxu1 %v228_v53 }
  0x75   : > { %380 = vmatmul.mubr.f32.gmra.mxu0 %v227_v52  ;;  %736 = vmatmul.mubr.f32.gmra.mxu1 %v229_v55 }
  0x76   : > { %385 = vmatprep.mubr.f32.mxu0 %v1002_v0  ;;  %738 = vmatprep.mubr.f32.mxu1 %v230_v54 }
  0x79   : > { %386 = vmatmul.mubr.f32.gmra.mxu0 %v228_v53  ;;  %739 = vmatmul.mubr.f32.gmra.mxu1 %v231_v56 }
  0x7a   : > { %391 = vmatprep.mubr.f32.mxu0 %v1002_v0 }
  0x7d   : > { %392 = vmatmul.mubr.f32.gmra.mxu0 %v229_v55 }
  0x7e   : > { %397 = vmatprep.mubr.f32.mxu0 %v1002_v0 }
  0x81   : > { %398 = vmatmul.mubr.f32.gmra.mxu0 %v230_v54 }
  0x82   : > { %403 = vmatprep.mubr.f32.mxu0 %v1002_v0  ;;  %v293_v0 = vrot.slane %v280_v60, %v292_v63 }
  0x85   : > { %404 = vmatmul.mubr.f32.gmra.mxu0 %v231_v56 }
 0x129   : > { %v363_v2 = vpop.f32.mrf.mxu0 }
 0x12a   : > { %v364_v3 = vadd.f32 %v363_v2, %v1185_v62 }
 0x12b   : > { %v365_v4 = vpop.f32.mrf.mxu0 }
 0x12c   : > { %515 = vst [vmem:[%s1190_s26] sm:$0xff] %v364_v3  ;;  %v366_v5 = vadd.f32 %v365_v4, %v1187_v1 }
 0x12d   : > { %v369_v6 = vpop.f32.mrf.mxu0  ;;  %v731_v8 = vpop.f32.mrf.mxu1 }
 0x12e   : > { %516 = vst [vmem:[%s1190_s26 + $0x8] sm:$0xff] %v366_v5  ;;  %v370_v7 = vadd.f32 %v369_v6, %v1185_v62  ;;  %v482_v10 = vadd.f32 %v731_v8, %v293_v0 }
 0x12f   : > { %v371_v9 = vpop.f32.mrf.mxu0  ;;  %v476_v12 = vpop.f32.mrf.mxu1 }
 0x130   : > { %518 = vst [vmem:[%s1190_s26 + $0x18] sm:$0xff] %v370_v7  ;;  %v372_v11 = vadd.f32 %v371_v9, %v1187_v1  ;;  %520 = vst [vmem:[%s1190_s26 + $0x28] sm:$0xff] %v482_v10  ;;  %v477_v14 = vadd.f32 %v476_v12, %v293_v0 }
 0x131   : > { %v375_v13 = vpop.f32.mrf.mxu0  ;;  %v734_v16 = vpop.f32.mrf.mxu1 }
 0x132   : > { %519 = vst [vmem:[%s1190_s26 + $0x20] sm:$0xff] %v372_v11  ;;  %v376_v15 = vadd.f32 %v375_v13, %v1185_v62  ;;  %517 = vst [vmem:[%s1190_s26 + $0x10] sm:$0xff] %v477_v14  ;;  %v492_v18 = vadd.f32 %v734_v16, %v293_v0 }
 0x133   : > { %v377_v17 = vpop.f32.mrf.mxu0  ;;  %v486_v20 = vpop.f32.mrf.mxu1 }
 0x134   : > { %521 = vst [vmem:[%s1190_s26 + $0x30] sm:$0xff] %v376_v15  ;;  %v378_v19 = vadd.f32 %v377_v17, %v1187_v1  ;;  %526 = vst [vmem:[%s1190_s26 + $0x58] sm:$0xff] %v492_v18  ;;  %v487_v22 = vadd.f32 %v486_v20, %v293_v0 }
 0x135   : > { %v381_v21 = vpop.f32.mrf.mxu0  ;;  %v737_v24 = vpop.f32.mrf.mxu1 }
 0x136   : > { %522 = vst [vmem:[%s1190_s26 + $0x38] sm:$0xff] %v378_v19  ;;  %v382_v23 = vadd.f32 %v381_v21, %v1185_v62  ;;  %523 = vst [vmem:[%s1190_s26 + $0x40] sm:$0xff] %v487_v22  ;;  %v502_v26 = vadd.f32 %v737_v24, %v293_v0 }
 0x137   : > { %v383_v25 = vpop.f32.mrf.mxu0  ;;  %v496_v28 = vpop.f32.mrf.mxu1 }
 0x138   : > { %524 = vst [vmem:[%s1190_s26 + $0x48] sm:$0xff] %v382_v23  ;;  %v384_v27 = vadd.f32 %v383_v25, %v1187_v1  ;;  %532 = vst [vmem:[%s1190_s26 + $0x88] sm:$0xff] %v502_v26  ;;  %v497_v30 = vadd.f32 %v496_v28, %v293_v0 }
 0x139   : > { %v387_v29 = vpop.f32.mrf.mxu0  ;;  %v740_v32 = vpop.f32.mrf.mxu1 }
 0x13a   : > { %525 = vst [vmem:[%s1190_s26 + $0x50] sm:$0xff] %v384_v27  ;;  %v388_v31 = vadd.f32 %v387_v29, %v1185_v62  ;;  %529 = vst [vmem:[%s1190_s26 + $0x70] sm:$0xff] %v497_v30  ;;  %v512_v34 = vadd.f32 %v740_v32, %v293_v0 }
 0x13b   : > { %v389_v33 = vpop.f32.mrf.mxu0  ;;  %v506_v36 = vpop.f32.mrf.mxu1 }
 0x13c   : > { %527 = vst [vmem:[%s1190_s26 + $0x60] sm:$0xff] %v388_v31  ;;  %v390_v35 = vadd.f32 %v389_v33, %v1187_v1  ;;  %538 = vst [vmem:[%s1190_s26 + $0xb8] sm:$0xff] %v512_v34  ;;  %v507_v38 = vadd.f32 %v506_v36, %v293_v0 }
 0x13d   : > { %v393_v37 = vpop.f32.mrf.mxu0 }
 0x13e   : > { %528 = vst [vmem:[%s1190_s26 + $0x68] sm:$0xff] %v390_v35  ;;  %v394_v39 = vadd.f32 %v393_v37, %v1185_v62  ;;  %535 = vst [vmem:[%s1190_s26 + $0xa0] sm:$0xff] %v507_v38 }
 0x13f   : > { %v395_v40 = vpop.f32.mrf.mxu0 }
 0x140   : > { %530 = vst [vmem:[%s1190_s26 + $0x78] sm:$0xff] %v394_v39  ;;  %v396_v41 = vadd.f32 %v395_v40, %v1187_v1 }
 0x141   : > { %v399_v42 = vpop.f32.mrf.mxu0 }
 0x142   : > { %531 = vst [vmem:[%s1190_s26 + $0x80] sm:$0xff] %v396_v41  ;;  %v400_v43 = vadd.f32 %v399_v42, %v1185_v62 }
 0x143   : > { %v401_v44 = vpop.f32.mrf.mxu0 }
 0x144   : > { %533 = vst [vmem:[%s1190_s26 + $0x90] sm:$0xff] %v400_v43  ;;  %v402_v45 = vadd.f32 %v401_v44, %v1187_v1 }
 0x145   : > { %v405_v46 = vpop.f32.mrf.mxu0 }
 0x146   : > { %534 = vst [vmem:[%s1190_s26 + $0x98] sm:$0xff] %v402_v45  ;;  %v406_v47 = vadd.f32 %v405_v46, %v1185_v62 }
 0x147   : > { %v407_v48 = vpop.f32.mrf.mxu0 }
 0x148   : > { %536 = vst [vmem:[%s1190_s26 + $0xa8] sm:$0xff] %v406_v47  ;;  %v408_v49 = vadd.f32 %v407_v48, %v1187_v1 }
 0x14a   : > { %537 = vst [vmem:[%s1190_s26 + $0xb0] sm:$0xff] %v408_v49 }
 0x14b   : > { %907 = shalt.err (!%p904_p5)
}
 0x14c   : > { %s908_s7 = scalar_lea.hbm %s1234_s29, 3072  ;;  %s912_s22 = scalar_lea.hbm %s1295_s3, 12288 }
 0x14d   : > { %p909_p4 = scmp.ne.s32.totalorder %s1234_s29, %s908_s7  ;;  %p913_p9 = scmp.lt.s32.totalorder %s1234_s29, %s1295_s3 }
 0x14e   : > { %p914_p10 = scmp.lt.s32.totalorder %s912_s22, %s908_s7 }
 0x14f   : > { %p910_p6 = pnand %p909_p4, %p1114_p11 }
 0x150   : > { %p915_p12 = por %p914_p10, %p913_p9 }
 0x151   : > { %p911_p7 = pneg %p910_p6 }
 0x153   : > { %p916_p1 = pnand %p915_p12, %p911_p7 }
 0x155   : > { %919 = shalt.err (!%p916_p1)
}
 0x156   : > { %s1004_s26 = smov 384   ;;  %s1005_s23 = smov 24  }
 0x157   : > { %750 = dma.vmem_to_hbm [thread:$0]  (%p1114_p11), %s1236_s16, 3072, %s1234_s29, %s540_s9, %s1004_s26, %s1004_s26, %s1005_s23  }
 0x158 PF: > { %s1316_s4 = sld [smem:[#allocation11_spill]]  ;;  %p767_p8 = scmp.ge.s32.totalorder %s994_s19, 2 }
 0x159   : > { %s1317_s5 = sld [smem:[#allocation13_spill]] }
 0x15e   : > { %s571_s15 = sand.u32 1, %s1316_s4  }
 0x15f   : > { %p1318_p13 = scmp.ne.s32.totalorder %s1317_s5, 0  ;;  %s572_s10 = scalar_lea.sflag [#allocation4], %s571_s15 }
 0x161   : > { %p761_p2 = pnand %p767_p8, %p1318_p13 }
 0x163   : > { %p762_p0 = pneg %p761_p2 }
 0x165   : > { %961 = dma.done.wait (%p762_p0), %s572_s10, 3072  }
 0x166   : > { %963 = vsyncadd (%p762_p0), %s572_s10, 4294964224  ;;  %s20_s19 = sadd.s32 1, %s994_s19   ;;  %s1319_s15 = sld [smem:[#allocation12_spill]] }
 0x167   : > { %p17_p3 = scmp.ge.s32.totalorder %s20_s19, 6   ;;  %s1320_s17 = sld [smem:[#allocation14_spill]] }
 0x168   : > { %s1321_s12 = smov %s970_s13  ;;  %s1322_s13 = smov %s974_s14 }
 0x169   : > { %s1323_s14 = smov %s1131_s6  ;;  %s1324_s16 = smov %s990_s18 }
 0x16a   : > { %s1325_s18 = smov %s1331_s8  ;;  %19 = sbr.rel (!%p17_p3) target bundleno = 10 (0xa), region = 81 }
 0x16f   :  { %577 = vsyncpa [#allocation3], 1 }
 0x170   :  { %579 = vsyncpa [#allocation3 + $0x1], 1 }
 0x171   :  { %580 = vsyncpa [#allocation6], 1 }
 0x172   :  { %581 = vsyncpa [#allocation4], 1 }
 0x173   :  { %583 = vsyncpa [#allocation4 + $0x1], 1 }

</bundles_post_ra>
